<compile_context>
chip_gen: v6e
topology: v6e:2x2x1
jax: 0.10.0
libtpu: 0.0.40
codegen_flags: <defaults>
</compile_context>

<pallas_src>
import functools

import jax
import jax.numpy as jnp
from jax.experimental import pallas as pl
from jax.experimental.pallas import tpu as pltpu


# --------------------------------------------------------------------------- #
# Kernels
# --------------------------------------------------------------------------- #
def _norm_scale_store(x_f32, w_ref, o_ref, group_size, eps):
    """Grouped RMS-normalize x_f32 (tr, c), scale by weight, store to o_ref."""
    tr, c = x_f32.shape
    g = c // group_size
    xg = x_f32.reshape(tr, g, group_size)
    # Fused square + cross-lane reduce (XLU); mean = sum * (1/group_size).
    ss = jnp.sum(xg * xg, axis=-1, keepdims=True)           # (tr, g, 1)
    rstd = jax.lax.rsqrt(ss * (1.0 / group_size) + eps)     # EUP rsqrt
    # Weight block is a tiny (1, c) f32 tile; reshape it (cheap) so the scale
    # happens inside the (tr, g, group_size) form without an extra (tr, c)
    # full-tile temporary.
    w = w_ref[...].reshape(1, g, group_size)
    o_ref[...] = (xg * rstd * w).reshape(tr, c).astype(o_ref.dtype)


def _rmsnorm_gated_kernel(x_ref, z_ref, w_ref, o_ref, *, group_size, eps):
    x = x_ref[...].astype(jnp.float32)
    z = z_ref[...].astype(jnp.float32)
    # norm_before_gate=False -> silu(gate) multiplies x BEFORE the norm.
    # jax.nn.sigmoid lowers to an EUP transcendental on TPU, keeping the gate
    # math off the VALU/DMA critical path of this bandwidth-bound kernel.
    x = x * (z * jax.nn.sigmoid(z))
    _norm_scale_store(x, w_ref, o_ref, group_size, eps)


def _rmsnorm_kernel(x_ref, w_ref, o_ref, *, group_size, eps):
    _norm_scale_store(x_ref[...].astype(jnp.float32), w_ref, o_ref,
                      group_size, eps)


# --------------------------------------------------------------------------- #
# VMEM budget / tile selection
# --------------------------------------------------------------------------- #
def _round_up(x, m):
    return -(-x // m) * m


def _vmem_budget():
    """(live-block byte budget, vmem_limit_bytes) sized per TPU generation."""
    vmem_cap = 64 * 1024 * 1024                      # conservative default (v7x)
    try:
        info = pltpu.get_tpu_info()
        vmem_cap = int(getattr(info, "vmem_capacity_bytes", vmem_cap))
    except Exception:
        pass
    if vmem_cap >= 128 * 1024 * 1024:                # v5e / v6e (and v4/v5p)
        return 80 * 1024 * 1024, 104 * 1024 * 1024
    return 36 * 1024 * 1024, 48 * 1024 * 1024        # v7x / unknown


def _choose_tiles(n_rows, hidden, group_size, x_bytes, z_bytes, o_bytes, budget):
    """Pick (row_tile, col_tile) from a byte budget (no arbitrary row cap).

    col_tile == hidden unless even a minimal row tile overflows the budget, in
    which case the hidden dim is chunked in multiples of group_size (groups
    are independent, so no cross-block reduction is needed).
    """
    x_bytes = max(int(x_bytes), 1)
    align = max(8, 32 // x_bytes)                    # 8 f32, 16 bf16, 32 int8
    gated = z_bytes > 0
    f32_tmps = 6 if gated else 4                     # full-tile f32 intermediates
    io = 2 * (x_bytes + o_bytes + z_bytes)           # double-buffered I/O blocks
    per_elem = io + 4 * f32_tmps

    col = hidden
    if align * hidden * per_elem > budget and group_size % 128 == 0:
        gc = max(1, budget // (align * group_size * per_elem))
        gc = min(hidden // group_size, gc)
        col = gc * group_size

    tr = budget // max(col * per_elem, 1)
    tr = max(align, (tr // align) * align)

    if tr >= n_rows:
        # Keep >= 2 row blocks when possible (megacore / v7x dual TensorCore);
        # otherwise a single full-extent row block (always BlockSpec-legal).
        half = _round_up(-(-n_rows // 2), align)
        tr = half if (n_rows > align and half < n_rows) else n_rows
    return tr, col


# --------------------------------------------------------------------------- #
# Wrapper
# --------------------------------------------------------------------------- #
def mamba_rmsnorm_gated(hidden_states, weight, gate=None, *, group_size,
                        eps=1e-5, row_tile=None, col_tile=None):
    """Pallas TPU implementation of MambaRMSNormGated.forward.

    hidden_states: (..., H); gate: same shape or None; weight: (H,)
    """
    orig_shape = hidden_states.shape
    H = orig_shape[-1]
    assert H % group_size == 0, "hidden_size must be divisible by group_size"

    x2d = hidden_states.reshape(-1, H)
    N = x2d.shape[0]
    gated = gate is not None

    budget, vmem_limit = _vmem_budget()
    x_bytes = jnp.dtype(hidden_states.dtype).itemsize
    z_bytes = jnp.dtype(gate.dtype).itemsize if gated else 0
    tr_auto, col_auto = _choose_tiles(N, H, group_size, x_bytes, z_bytes,
                                      x_bytes, budget)
    tr = int(row_tile) if row_tile is not None else tr_auto
    col = int(col_tile) if col_tile is not None else col_auto
    assert col % group_size == 0, "col_tile must be a multiple of group_size"
    assert col == H or col % 128 == 0, "partial hidden blocks must be lane-aligned"

    grid = (pl.cdiv(N, tr), pl.cdiv(H, col))         # ragged N/H: partial blocks

    # Hoist the weight upcast out of the kernel; constant row index keeps the
    # block resident in VMEM across row steps.
    w2d = weight.astype(jnp.float32).reshape(1, H)

    x_spec = pl.BlockSpec((tr, col), lambda i, j: (i, j))
    w_spec = pl.BlockSpec((1, col), lambda i, j: (0, j))
    out_spec = pl.BlockSpec((tr, col), lambda i, j: (i, j))
    out_shape = jax.ShapeDtypeStruct((N, H), hidden_states.dtype)

    cparams = pltpu.CompilerParams(
        dimension_semantics=("parallel", "parallel"),
        vmem_limit_bytes=vmem_limit,
    )

    if gated:
        z2d = gate.reshape(-1, H)
        kernel = functools.partial(_rmsnorm_gated_kernel,
                                   group_size=group_size, eps=float(eps))
        in_specs = [x_spec, x_spec, w_spec]
        operands = (x2d, z2d, w2d)
    else:
        kernel = functools.partial(_rmsnorm_kernel,
                                   group_size=group_size, eps=float(eps))
        in_specs = [x_spec, w_spec]
        operands = (x2d, w2d)

    out = pl.pallas_call(
        kernel,
        out_shape=out_shape,
        grid_spec=pltpu.PrefetchScalarGridSpec(
            num_scalar_prefetch=0,
            grid=grid,
            in_specs=in_specs,
            out_specs=out_spec,
        ),
        compiler_params=cparams,
    )(*operands)

    return out.reshape(orig_shape)


# --------------------------------------------------------------------------- #
# Pure-JAX reference (mirrors mamba_ssm's rms_norm_ref, norm_before_gate=False)
# --------------------------------------------------------------------------- #
def _reference(hidden_states, weight, gate, group_size, eps):
    dtype = hidden_states.dtype
    x = hidden_states.astype(jnp.float32)
    w = weight.astype(jnp.float32)
    if gate is not None:
        z = gate.astype(jnp.float32)
        x = x * (z * jax.nn.sigmoid(z))
    g = x.shape[-1] // group_size
    xg = x.reshape(*x.shape[:-1], g, group_size)
    rstd = jax.lax.rsqrt(jnp.mean(xg * xg, axis=-1, keepdims=True) + eps)
    out = (xg * rstd).reshape(x.shape) * w
    return out.astype(dtype)


if __name__ == "__main__":
    eps = 1e-5
    key = jax.random.PRNGKey(0)
    k_x, k_z, k_w, k_x2, k_z2 = jax.random.split(key, 5)

    batch, seq, hidden = 2, 8, 256
    group_size = 128
    hs = jax.random.normal(k_x, (batch, seq, hidden), dtype=jnp.float32)
    gt = jax.random.normal(k_z, (batch, seq, hidden), dtype=jnp.float32)
    w = jnp.ones((hidden,), dtype=jnp.float32) \
        + 0.01 * jax.random.normal(k_w, (hidden,), dtype=jnp.float32)

    # --- Test 1: gated f32, auto tiles (2 row blocks) ------------------------
    out = jax.block_until_ready(
        mamba_rmsnorm_gated(hs, w, gt, group_size=group_size, eps=eps))
    ref = _reference(hs, w, gt, group_size, eps)
    assert out.shape == hs.shape and out.dtype == hs.dtype
    assert jnp.allclose(out, ref, atol=1e-5, rtol=1e-5), "gated f32 mismatch"

    # --- Test 2: gate=None path ----------------------------------------------
    out_ng = jax.block_until_ready(
        mamba_rmsnorm_gated(hs, w, None, group_size=group_size, eps=eps))
    ref_ng = _reference(hs, w, None, group_size, eps)
    assert jnp.allclose(out_ng, ref_ng, atol=1e-5, rtol=1e-5), "no-gate mismatch"

    # --- Test 3: ragged row count + bf16, auto tiles (no pad / slice) --------
    b3, s3 = 3, 5                                     # N = 15 rows (ragged)
    hs_bf = jax.random.normal(k_x2, (b3, s3, hidden), jnp.float32).astype(jnp.bfloat16)
    gt_bf = jax.random.normal(k_z2, (b3, s3, hidden), jnp.float32).astype(jnp.bfloat16)
    out_bf = jax.block_until_ready(
        mamba_rmsnorm_gated(hs_bf, w, gt_bf, group_size=group_size, eps=eps))
    ref_bf = _reference(hs_bf, w, gt_bf, group_size, eps)
    assert out_bf.shape == hs_bf.shape and out_bf.dtype == jnp.bfloat16
    assert jnp.allclose(out_bf.astype(jnp.float32), ref_bf.astype(jnp.float32),
                        atol=2e-2, rtol=2e-2), "ragged bf16 mismatch"

    # --- Test 4: forced partial last row block + hidden-dim chunking ---------
    hs_r = jax.random.normal(k_x2, (b3, s3, hidden), dtype=jnp.float32)
    gt_r = jax.random.normal(k_z2, (b3, s3, hidden), dtype=jnp.float32)
    out_r = jax.block_until_ready(
        mamba_rmsnorm_gated(hs_r, w, gt_r, group_size=group_size, eps=eps,
                            row_tile=8, col_tile=128))
    ref_r = _reference(hs_r, w, gt_r, group_size, eps)
    assert jnp.allclose(out_r, ref_r, atol=1e-5, rtol=1e-5), \
        "partial-block / col-chunk mismatch"

    print("KERNEL_OK")
</pallas_src>

<mosaic_0001>
module attributes {stable_mosaic.version = 11 : i64} {
  func.func @_rmsnorm_gated_kernel(%arg0: i32, %arg1: i32, %arg2: memref<8x256xf32, #tpu.memory_space<vmem>>, %arg3: memref<8x256xf32, #tpu.memory_space<vmem>>, %arg4: memref<1x256xf32, #tpu.memory_space<vmem>>, %arg5: memref<8x256xf32, #tpu.memory_space<vmem>>) attributes {dimension_semantics = [#tpu.dimension_semantics<parallel>, #tpu.dimension_semantics<parallel>], iteration_bounds = array<i64: 2, 1>, scalar_prefetch = 0 : i64, scratch_operands = 0 : i64, tpu.core_type = #tpu.core_type<tc>, window_params = [{transform_indices = @transform_0, window_bounds = array<i64: 8, 256>}, {transform_indices = @transform_1, window_bounds = array<i64: 8, 256>}, {transform_indices = @transform_2, window_bounds = array<i64: 1, 256>}, {transform_indices = @transform_3, window_bounds = array<i64: 8, 256>}]} {
    %c0 = arith.constant 0 : index
    %c0_0 = arith.constant 0 : index
    %0 = vector.load %arg2[%c0, %c0_0] : memref<8x256xf32, #tpu.memory_space<vmem>>, vector<8x256xf32>
    %c0_1 = arith.constant 0 : index
    %c0_2 = arith.constant 0 : index
    %1 = vector.load %arg3[%c0_1, %c0_2] : memref<8x256xf32, #tpu.memory_space<vmem>>, vector<8x256xf32>
    %2 = arith.negf %1 : vector<8x256xf32>
    %3 = math.exp %2 : vector<8x256xf32>
    %cst = arith.constant 1.000000e+00 : f32
    %4 = vector.broadcast %cst : f32 to vector<8x256xf32>
    %5 = arith.addf %4, %3 : vector<8x256xf32>
    %6 = arith.divf %4, %5 : vector<8x256xf32>
    %7 = arith.mulf %1, %6 : vector<8x256xf32>
    %8 = arith.mulf %0, %7 : vector<8x256xf32>
    %9 = vector.shape_cast %8 : vector<8x256xf32> to vector<8x2x128xf32>
    %10 = arith.mulf %9, %9 : vector<8x2x128xf32>
    %cst_3 = arith.constant dense<0.000000e+00> : vector<8x2xf32>
    %11 = vector.multi_reduction <add>, %10, %cst_3 [2] : vector<8x2x128xf32> to vector<8x2xf32>
    %12 = vector.shape_cast %11 : vector<8x2xf32> to vector<8x2x1xf32>
    %cst_4 = arith.constant 7.812500e-03 : f32
    %13 = vector.broadcast %cst_4 : f32 to vector<8x2x1xf32>
    %14 = arith.mulf %12, %13 : vector<8x2x1xf32>
    %cst_5 = arith.constant 9.99999974E-6 : f32
    %15 = vector.broadcast %cst_5 : f32 to vector<8x2x1xf32>
    %16 = arith.addf %14, %15 : vector<8x2x1xf32>
    %17 = math.rsqrt %16 : vector<8x2x1xf32>
    %c0_6 = arith.constant 0 : index
    %c0_7 = arith.constant 0 : index
    %18 = vector.load %arg4[%c0_6, %c0_7] : memref<1x256xf32, #tpu.memory_space<vmem>>, vector<1x256xf32>
    %19 = vector.shape_cast %18 : vector<1x256xf32> to vector<1x2x128xf32>
    %20 = vector.broadcast %17 : vector<8x2x1xf32> to vector<8x2x128xf32>
    %21 = arith.mulf %9, %20 : vector<8x2x128xf32>
    %22 = vector.broadcast %19 : vector<1x2x128xf32> to vector<8x2x128xf32>
    %23 = arith.mulf %21, %22 : vector<8x2x128xf32>
    %24 = vector.shape_cast %23 : vector<8x2x128xf32> to vector<8x256xf32>
    %c0_8 = arith.constant 0 : index
    %c0_9 = arith.constant 0 : index
    %25 = vector.load %arg5[%c0_8, %c0_9] : memref<8x256xf32, #tpu.memory_space<vmem>>, vector<8x256xf32>
    tpu.vector_store %arg5[%c0_8, %c0_9], %24 {strides = array<i32>} : memref<8x256xf32, #tpu.memory_space<vmem>>, vector<8x256xf32>,
    return
  }
  func.func @transform_0(%arg0: i32, %arg1: i32) -> (i32, i32) {
    %c0_i32 = arith.constant 0 : i32
    return %arg0, %arg1 : i32, i32
  }
  func.func @transform_1(%arg0: i32, %arg1: i32) -> (i32, i32) {
    %c0_i32 = arith.constant 0 : i32
    return %arg0, %arg1 : i32, i32
  }
  func.func @transform_2(%arg0: i32, %arg1: i32) -> (i32, i32) {
    %c0_i32 = arith.constant 0 : i32
    %c0_i32_0 = arith.constant 0 : i32
    return %c0_i32, %arg1 : i32, i32
  }
  func.func @transform_3(%arg0: i32, %arg1: i32) -> (i32, i32) {
    %c0_i32 = arith.constant 0 : i32
    return %arg0, %arg1 : i32, i32
  }
}

</mosaic_0001>

<bundles_post_ra>
// kernel: tpu_custom_call.1
= control target key start
LH: loop header
LB: loop body
LE: loop exit
PB: predicated region body
PF: predicated region fallthrough
CT: control target
= control target key end

     0   :  { %8 = vsyncpa [#allocation3], 0  ;;  %s1177_s0 = inlined_call_operand.hbm [shape: f32[16,256], index: 0, kind: input, shape index: {}]   ;;  %s1178_s1 = inlined_call_operand.hbm [shape: f32[16,256], index: 1, kind: input, shape index: {}]   ;;  %s1179_s2 = inlined_call_operand.vmem [shape: f32[1,256], index: 2, kind: input, shape index: {}]   ;;  %s1180_s3 = inlined_call_operand.hbm [shape: f32[16,256], index: 3, kind: output, shape index: {}]  }
   0x1   :  { %10 = vsyncpa [#allocation3 + $0x1], 0 }
   0x2   :  { %11 = vsyncpa [#allocation6], 0 }
   0x3   :  { %13 = vsyncpa [#allocation6 + $0x1], 0 }
   0x4   :  { %14 = vsyncpa [#allocation4], 0 }
   0x5   :  { %16 = vsyncpa [#allocation4 + $0x1], 0  ;;  %s927_s12 = smov 0   ;;  %s929_s13 = smov 0  }
   0x6   :  { %s931_s14 = smov 0   ;;  %s933_s15 = smov 0  }
   0x7   :  { %s935_s16 = smov 0   ;;  %s937_s17 = smov 0  }
   0x8 LB: > { %s638_s18 = sadd.s32 4294967295, %s898_s17   ;;  %s639_s19 = sadd.s32 4294967294, %s898_s17   ;;  %s898_s17 = sphi %s937_s17, %s22_s17   ;;  %s894_s16 = sphi %s935_s16, %s1192_s16   ;;  %s890_s15 = sphi %s933_s15, %s1191_s15   ;;  %s886_s14 = sphi %s931_s14, %s1190_s14   ;;  %s882_s13 = sphi %s929_s13, %s1189_s13   ;;  %s878_s12 = sphi %s927_s12, %s1188_s12  }
   0x9   : > { %s34_s20 = sadd.s32 1, %s894_s16  ;;  %s43_s21 = sadd.s32 1, %s886_s14 }
   0xa   : > { %p36_p0 = scmp.ge.s32.totalorder %s34_s20, 2  ;;  %p50_p1 = scmp.ne.s32.totalorder %s886_s14, %s882_s13 }
   0xb   : > { %p51_p2 = scmp.eq.s32.totalorder %s898_s17, 0  ;;  %p56_p3 = scmp.ne.s32.totalorder %s882_s13, %s878_s12 }
   0xc   : > { %s1194_s20 = smov (%p36_p0, %s34_s20), 0  ;;  %p57_p5 = scmp.eq.s32.totalorder %s638_s18, 0 }
   0xd   : > { %p968_p4 = por %p51_p2, %p50_p1  ;;  %s38_s23 = ssub.s32 %s894_s16, %s1194_s20 }
   0xe   : > { %p136_p6 = scmp.eq.s32.totalorder %s638_s18, 1  ;;  %p41_p7 = scmp.eq.s32.totalorder %s38_s23, 0 }
   0xf   : > { %p974_p8 = por %p57_p5, %p56_p3  ;;  %p142_p10 = scmp.eq.s32.totalorder %s639_s19, 1 }
  0x10   : > { %p978_p9 = por %p136_p6, %p50_p1  ;;  %p680_p13 = scmp.lt.s32.totalorder %s898_s17, 2 }
  0x11   : > { %s983_s26 = scalar_select %p41_p7, %s886_s14, %s43_s21  }
  0x12   : > { %p985_p11 = por %p142_p10, %p56_p3  ;;  %s992_s28 = sand.u32 1, %s886_s14  }
  0x13   : > { %s643_s29 = sshll.u32 %s992_s28, 4  ;;  %s660_s30 = sshll.u32 %s894_s16, 8 }
  0x14   : > { %s182_s6 = scalar_lea.hbm %s1177_s0, %s660_s30  ;;  %s174_s7 = scalar_lea.vmem [#allocation2], %s643_s29 }
  0x15   : > { %s184_s8 = sshll.u32 %s174_s7, 4  ;;  %p1001_p0 = pnand %p680_p13, %p968_p4  ;;  %s185_s8 = int_to_ptr.vmem [resolvable:$true] %s184_s8 }
  0x16   : > { %p649_p1 = scmp.ge.s32.totalorder %s898_s17, 1  ;;  %p210_p2 = scmp.lt.s32.totalorder %s898_s17, 3 }
  0x17   : > { %s171_s10 = scalar_lea.sflag [#allocation3], %s992_s28  ;;  %p760_p3 = pneg %p1001_p0 }
  0x18   : > { %s771_s11 = scalar_lea.vmem %s185_s8, 256  ;;  %s900_s18 = smov [#allocation2]  }
  0x19   : > { %p772_p5 = scmp.ne.s32.totalorder %s185_s8, %s771_s11  ;;  %s776_s19 = sshll.u32 %s900_s18, 4  ;;  %s777_s19 = int_to_ptr.vmem [resolvable:$false] %s776_s19 }
  0x1a   : > { %s778_s21 = scalar_lea.vmem %s777_s19, 512  ;;  %p779_p4 = scmp.lt.s32.totalorder %s185_s8, %s777_s19 }
  0x1b   : > { %p774_p6 = pnand %p772_p5, %p760_p3  ;;  %p780_p10 = scmp.lt.s32.totalorder %s778_s21, %s771_s11 }
  0x1d   : > { %p775_p7 = pneg %p774_p6  ;;  %p781_p13 = por %p780_p10, %p779_p4 }
  0x1f   : > { %p782_p12 = pnand %p781_p13, %p775_p7 }
  0x21   : > { %785 = shalt.err (!%p782_p12)
}
  0x22   : > { %672 = dma.hbm_to_vmem [thread:$0]  (!%p1001_p0), %s182_s6, 256, %s185_s8, %s171_s10  }
  0x23   : > { %p1019_p5 = pnand %p649_p1, %p210_p2  ;;  %s203_s5 = scalar_lea.hbm %s1178_s1, %s660_s30 }
  0x24   : > { %s195_s7 = scalar_lea.vmem [#allocation5], %s643_s29  ;;  %s192_s18 = scalar_lea.sflag [#allocation6], %s992_s28 }
  0x25   : > { %s205_s11 = sshll.u32 %s195_s7, 4  ;;  %s901_s6 = smov [#allocation5]   ;;  %s206_s11 = int_to_ptr.vmem [resolvable:$true] %s205_s11 }
  0x26   : > { %s799_s19 = scalar_lea.vmem %s206_s11, 256  ;;  %s804_s8 = sshll.u32 %s901_s6, 4  ;;  %s805_s8 = int_to_ptr.vmem [resolvable:$false] %s804_s8 }
  0x27   : > { %p800_p12 = scmp.ne.s32.totalorder %s206_s11, %s799_s19  ;;  %s806_s10 = scalar_lea.vmem %s805_s8, 512 }
  0x28   : > { %p807_p1 = scmp.lt.s32.totalorder %s206_s11, %s805_s8  ;;  %p808_p2 = scmp.lt.s32.totalorder %s806_s10, %s799_s19 }
  0x29   : > { %p802_p6 = pnand %p800_p12, %p760_p3 }
  0x2a   : > { %p809_p4 = por %p808_p2, %p807_p1 }
  0x2b   : > { %p803_p7 = pneg %p802_p6 }
  0x2d   : > { %p810_p10 = pnand %p809_p4, %p803_p7 }
  0x2f   : > { %813 = shalt.err (!%p810_p10)
}
  0x30   : > { %675 = dma.hbm_to_vmem [thread:$0]  (!%p1001_p0), %s203_s5, 256, %s206_s11, %s192_s18  }
  0x31   : > { %214 = sbr.rel (%p1019_p5) target bundleno = 300 (0x12c), region = 32  ;;  %s1035_s28 = sand.u32 (!%p1019_p5), 1, %s882_s13  }
  0x32   : > { %s1038_s29 = sshll.u32 (!%p1019_p5), %s1035_s28, 4  ;;  %s217_s30 = scalar_lea.sflag (!%p1019_p5), [#allocation3], %s1035_s28 }
  0x33   : > { %s220_s21 = scalar_lea.vmem (!%p1019_p5), [#allocation2], %s1038_s29 }
  0x36   : > { %865 = dma.done.wait (%p974_p8), %s217_s30, 256  }
  0x37   : > { %867 = vsyncadd (%p974_p8), %s217_s30, 4294967040  ;;  %s226_s9 = scalar_lea.sflag [#allocation6], %s1035_s28  ;;  %s229_s22 = scalar_lea.vmem [#allocation5], %s1038_s29 }
  0x38   : > { %869 = dma.done.wait (%p974_p8), %s226_s9, 256  }
  0x39   : > { %871 = vsyncadd (%p974_p8), %s226_s9, 4294967040  ;;  %v271_v0 = vld [vmem:[%s229_s22] sm:$0xff]  ;;  %v272_v1 = vld [vmem:[%s229_s22 + $0x8] sm:$0xff]  ;;  %v902_v8 = vmov 1983009808   ;;  %v293_v10 = vlaneseq  ;;  %v904_v26 = vmov 0.0  }
  0x3a   : > { %v653_v2 = vmul.f32 -1.442695, %v271_v0  ;;  %v654_v3 = vmul.f32 -1.442695, %v272_v1  ;;  %v291_v9 = vunpack.c.l.s4 %v902_v8  ;;  %v903_v13 = vmov 1934713408  }
  0x3b   : > { %v1052_v12 = vshrl.u32 %v293_v10, 7  ;;  %v322_v14 = vunpack.c.l.s4 %v903_v13  ;;  %v269_v16 = vld [vmem:[%s220_s21] sm:$0xff]  ;;  %v270_v18 = vld [vmem:[%s220_s21 + $0x8] sm:$0xff]  ;;  %vm363_vm0 = vcmask 1041408   ;;  %s662_s4 = sshll.u32 %s890_s15, 8  ;;  %s260_s5 = scalar_lea.vmem [#allocation7], %s1038_s29 }
  0x3c   : > { %734 = vpow2.f32 %v653_v2  ;;  %v292_v11 = vunpack.c.0.s8 %v291_v9  ;;  %v905_v9 = vmov 1966171168   ;;  %s516_s7 = sshll.u32 %s260_s5, 4  ;;  %s1135_s19 = scalar_lea.hbm %s1180_s3, %s662_s4  ;;  %s517_s7 = int_to_ptr.vmem [resolvable:$true] %s516_s7 }
  0x3d   : > { %736 = vpow2.f32 %v654_v3  ;;  %v323_v22 = vunpack.c.0.s8 %v322_v14  ;;  %v425_v10 = vunpack.c.l.s4 %v905_v9  ;;  %v412_v14 = vld [vmem:[%s1179_s2] sm:$0x3]  ;;  %s500_s6 = scalar_lea.sflag [#allocation4], %s1035_s28  ;;  %s814_s8 = scalar_lea.vmem %s517_s7, 256 }
  0x3e   : > { %v1055_v20 = vsub.s32 %v292_v11, %v1052_v12  ;;  %p815_p8 = scmp.ne.s32.totalorder %s517_s7, %s814_s8  ;;  %s906_s15 = smov [#allocation7]  }
  0x3f   : > { %v1060_v29 = vsub.s32 %v323_v22, %v1052_v12  ;;  %s818_s10 = sshll.u32 %s906_s15, 4  ;;  %s819_s10 = int_to_ptr.vmem [resolvable:$false] %s818_s10 }
  0x40   : > { %p816_p0 = pnand %p815_p8, %p978_p9  ;;  %s820_s29 = scalar_lea.vmem %s819_s10, 512 }
  0x41   : > { %p821_p13 = scmp.lt.s32.totalorder %s517_s7, %s819_s10  ;;  %p822_p5 = scmp.lt.s32.totalorder %s820_s29, %s814_s8 }
  0x42   : > { %p817_p3 = pneg %p816_p0 }
  0x43   : > { %p823_p12 = por %p822_p5, %p821_p13 }
  0x45   : > { %p824_p6 = pnand %p823_p12, %p817_p3 }
  0x49   : > { %v735_v4 = vpop.eup %734 }
  0x4a   : > { %v737_v5 = vpop.eup %736  ;;  %v279_v6 = vadd.f32 1.0, %v735_v4 }
  0x4b   : > { %v280_v7 = vadd.f32 1.0, %v737_v5 }
  0x4c   : > { %738 = vrcp.f32 %v279_v6 }
  0x4d   : > { %740 = vrcp.f32 %v280_v7 }
  0x59   : > { %v739_v15 = vpop.eup %738 }
  0x5a   : > { %v741_v17 = vpop.eup %740  ;;  %v285_v19 = vmul.f32 %v739_v15, %v271_v0 }
  0x5b   : > { %v286_v21 = vmul.f32 %v741_v17, %v272_v1 }
  0x5c   : > { %v287_v23 = vmul.f32 %v285_v19, %v269_v16  ;;  %v414_v19 = vrot.slane %v412_v14, 1 }
  0x5d   : > { %v288_v24 = vmul.f32 %v286_v21, %v270_v18  ;;  %v426_v21 = vunpack.c.0.s8 %v425_v10 }
  0x5e   : > { %v296_v25 = vrot.slane %v287_v23, %v1055_v20  ;;  %v289_v27 = vcombine.high %v287_v23, %v904_v26 }
  0x5f   : > { %v311_v28 = vrot.slane %v288_v24, %v1055_v20  ;;  %v304_v30 = vcombine.high %v288_v24, %v904_v26 }
  0x60   : > { %v303_v31 = vrot.slane %v289_v27, %v1055_v20 }
  0x61   : > { %v320_v32 = vcombine.high %v296_v25, %v311_v28  ;;  %v319_v33 = vcombine.low %v296_v25, %v311_v28  ;;  %v318_v34 = vrot.slane %v304_v30, %v1055_v20  ;;  %v423_v28 = vcombine.low %v412_v14, %v414_v19 }
  0x62   : > { %v429_v30 = vsub.s32 %v426_v21, %v1052_v12 }
  0x63   : > { %v1065_v35 = vrot.slane %v320_v32, %v1060_v29  ;;  %v1068_v36 = vrot.slane %v319_v33, %v1060_v29  ;;  %v335_v37 = vcombine.low %v303_v31, %v318_v34  ;;  %v336_v38 = vcombine.high %v303_v31, %v318_v34 }
  0x64   : > { %v430_v32 = vrot.slane %v423_v28, %v429_v30 }
  0x65   : > { %v357_v39 = vmul.f32 %v1065_v35, %v1065_v35  ;;  %v355_v40 = vmul.f32 %v1068_v36, %v1068_v36  ;;  %v1075_v41 = vcombine.high %v1065_v35, %v904_v26  ;;  %v1078_v42 = vcombine.high %v1068_v36, %v904_v26 }
  0x66   : > { %v1081_v43 = vrot.slane %v335_v37, %v1060_v29  ;;  %v1084_v44 = vrot.slane %v336_v38, %v1060_v29 }
  0x67   : > { %v370_v45 = vsel %vm363_vm0, %v357_v39, 0.0  ;;  %v364_v46 = vsel %vm363_vm0, %v355_v40, 0.0  ;;  %v358_v47 = vmul.f32 %v1075_v41, %v1075_v41  ;;  %v356_v48 = vmul.f32 %v1078_v42, %v1078_v42 }
  0x68   : > { %371 = vadd.xlane.f32.xlu1 %v370_v45  ;;  %365 = vadd.xlane.f32.xlu0 %v364_v46  ;;  %v1093_v49 = vcombine.high %v1081_v43, %v904_v26  ;;  %v359_v52 = vmul.f32 %v1081_v43, %v1081_v43  ;;  %v1100_v53 = vcombine.high %v1084_v44, %v904_v26 }
  0x69   : > { %v373_v50 = vsel %vm363_vm0, %v358_v47, 0.0  ;;  %v367_v51 = vsel %vm363_vm0, %v356_v48, 0.0  ;;  %v361_v57 = vmul.f32 %v1084_v44, %v1084_v44  ;;  %v437_v39 = vrot.slane %v430_v32, %v429_v30 }
  0x6a   : > { %v360_v54 = vmul.f32 %v1093_v49, %v1093_v49  ;;  %v376_v55 = vsel %vm363_vm0, %v359_v52, 0.0  ;;  %v362_v58 = vmul.f32 %v1100_v53, %v1100_v53 }
  0x6b   : > { %v382_v59 = vsel %vm363_vm0, %v361_v57, 0.0 }
  0x6c   : > { %374 = vadd.xlane.f32.xlu1 %v373_v50  ;;  %368 = vadd.xlane.f32.xlu0 %v367_v51  ;;  %v379_v56 = vsel %vm363_vm0, %v360_v54, 0.0  ;;  %v385_v60 = vsel %vm363_vm0, %v362_v58, 0.0 }
  0x70   : > { %377 = vadd.xlane.f32.xlu0 %v376_v55  ;;  %380 = vadd.xlane.f32.xlu1 %v379_v56 }
  0x74   : > { %383 = vadd.xlane.f32.xlu0 %v382_v59  ;;  %386 = vadd.xlane.f32.xlu1 %v385_v60 }
  0xf1   : > { %v372_v61 = vpop.xlane.xlu1 %371  ;;  %v366_v62 = vpop.xlane.xlu0 %365 }
  0xf2   : > { %v390_v63 = vmul.f32 0.0078125, %v372_v61  ;;  %v388_v0 = vmul.f32 0.0078125, %v366_v62 }
  0xf4   : > { %v398_v1 = vadd.f32 1e-05, %v390_v63  ;;  %v396_v2 = vadd.f32 1e-05, %v388_v0 }
  0xf5   : > { %v375_v3 = vpop.xlane.xlu1 %374  ;;  %v369_v4 = vpop.xlane.xlu0 %368 }
  0xf6   : > { %v391_v5 = vmul.f32 0.0078125, %v375_v3  ;;  %v389_v6 = vmul.f32 0.0078125, %v369_v4  ;;  %742 = vrsqrt.f32 %v398_v1 }
  0xf7   : > { %744 = vrsqrt.f32 %v396_v2 }
  0xf8   : > { %v399_v7 = vadd.f32 1e-05, %v391_v5  ;;  %v397_v8 = vadd.f32 1e-05, %v389_v6 }
  0xf9   : > { %v378_v11 = vpop.xlane.xlu0 %377  ;;  %v381_v13 = vpop.xlane.xlu1 %380 }
  0xfa   : > { %746 = vrsqrt.f32 %v399_v7  ;;  %v392_v15 = vmul.f32 0.0078125, %v378_v11  ;;  %v393_v16 = vmul.f32 0.0078125, %v381_v13 }
  0xfb   : > { %748 = vrsqrt.f32 %v397_v8 }
  0xfc   : > { %v400_v17 = vadd.f32 1e-05, %v392_v15  ;;  %v401_v18 = vadd.f32 1e-05, %v393_v16 }
  0xfd   : > { %v384_v22 = vpop.xlane.xlu0 %383  ;;  %v387_v23 = vpop.xlane.xlu1 %386 }
  0xfe   : > { %750 = vrsqrt.f32 %v400_v17  ;;  %v394_v24 = vmul.f32 0.0078125, %v384_v22  ;;  %v395_v25 = vmul.f32 0.0078125, %v387_v23 }
  0xff   : > { %752 = vrsqrt.f32 %v401_v18 }
 0x100   : > { %v402_v26 = vadd.f32 1e-05, %v394_v24  ;;  %v403_v27 = vadd.f32 1e-05, %v395_v25 }
 0x102   : > { %754 = vrsqrt.f32 %v402_v26 }
 0x103   : > { %756 = vrsqrt.f32 %v403_v27  ;;  %v743_v31 = vpop.eup %742 }
 0x104   : > { %v745_v33 = vpop.eup %744  ;;  %v417_v40 = vmul.f32 %v743_v31, %v1065_v35 }
 0x105   : > { %v415_v45 = vmul.f32 %v745_v33, %v1068_v36 }
 0x106   : > { %v441_v51 = vmul.f32 %v437_v39, %v417_v40 }
 0x107   : > { %v747_v34 = vpop.eup %746  ;;  %v439_v52 = vmul.f32 %v437_v39, %v415_v45 }
 0x108   : > { %v749_v37 = vpop.eup %748  ;;  %v418_v38 = vmul.f32 %v747_v34, %v1075_v41 }
 0x109   : > { %v416_v46 = vmul.f32 %v749_v37, %v1078_v42  ;;  %v447_v36 = vcombine.low %v439_v52, %v441_v51 }
 0x10a   : > { %v442_v48 = vmul.f32 %v437_v39, %v418_v38 }
 0x10b   : > { %v751_v47 = vpop.eup %750  ;;  %v440_v50 = vmul.f32 %v437_v39, %v416_v46  ;;  %v454_v0 = vrot.slane %v447_v36, %v1055_v20 }
 0x10c   : > { %v753_v12 = vpop.eup %752  ;;  %v419_v54 = vmul.f32 %v751_v47, %v1081_v43 }
 0x10d   : > { %v455_v56 = vcombine.low %v440_v50, %v442_v48  ;;  %v420_v57 = vmul.f32 %v753_v12, %v1093_v49 }
 0x10e   : > { %v443_v58 = vmul.f32 %v437_v39, %v419_v54 }
 0x10f   : > { %v755_v55 = vpop.eup %754  ;;  %v444_v60 = vmul.f32 %v437_v39, %v420_v57  ;;  %v462_v62 = vrot.slane %v455_v56, %v1055_v20 }
 0x110   : > { %v757_v41 = vpop.eup %756  ;;  %v421_v35 = vmul.f32 %v755_v55, %v1084_v44 }
 0x111   : > { %v422_v42 = vmul.f32 %v757_v41, %v1100_v53  ;;  %v479_v44 = vcombine.low %v454_v0, %v462_v62 }
 0x112   : > { %v445_v59 = vmul.f32 %v437_v39, %v421_v35 }
 0x113   : > { %v446_v61 = vmul.f32 %v437_v39, %v422_v42  ;;  %v486_v53 = vrot.slane %v479_v44, %v1060_v29 }
 0x114   : > { %v463_v63 = vcombine.low %v443_v58, %v445_v59 }
 0x115   : > { %v471_v43 = vcombine.low %v444_v60, %v446_v61 }
 0x116   : > { %v470_v49 = vrot.slane %v463_v63, %v1055_v20 }
 0x117   : > { %v478_v1 = vrot.slane %v471_v43, %v1055_v20 }
 0x119   : > { %v487_v2 = vcombine.low %v470_v49, %v478_v1 }
 0x11b   : > { %v494_v3 = vrot.slane %v487_v2, %v1060_v29 }
 0x11d   : > { %v495_v4 = vcombine.low %v486_v53, %v494_v3  ;;  %v496_v5 = vcombine.high %v486_v53, %v494_v3 }
 0x11f   : > { %497 = vst [vmem:[%s260_s5] sm:$0xff] %v495_v4  ;;  %498 = vst [vmem:[%s260_s5 + $0x8] sm:$0xff] %v496_v5 }
 0x120   : > { %827 = shalt.err (!%p824_p6)
}
 0x121   : > { %s828_s30 = scalar_lea.hbm %s1135_s19, 256  ;;  %s832_s9 = scalar_lea.hbm %s1180_s3, 512 }
 0x122   : > { %p829_p7 = scmp.ne.s32.totalorder %s1135_s19, %s828_s30  ;;  %p833_p4 = scmp.lt.s32.totalorder %s1135_s19, %s1180_s3 }
 0x123   : > { %p834_p10 = scmp.lt.s32.totalorder %s832_s9, %s828_s30 }
 0x124   : > { %p830_p1 = pnand %p829_p7, %p978_p9 }
 0x125   : > { %p835_p8 = por %p834_p10, %p833_p4 }
 0x126   : > { %p831_p2 = pneg %p830_p1 }
 0x128   : > { %p836_p0 = pnand %p835_p8, %p831_p2 }
 0x12a   : > { %839 = shalt.err (!%p836_p0)
}
 0x12b   : > { %667 = dma.vmem_to_hbm [thread:$0]  (%p978_p9), %s517_s7, 256, %s1135_s19, %s500_s6  }
 0x12c PF: > { %s528_s23 = sand.u32 1, %s878_s12   ;;  %p1187_p3 = scmp.ge.s32.totalorder %s898_s17, 2 }
 0x12d   : > { %s529_s4 = scalar_lea.sflag [#allocation4], %s528_s23 }
 0x12e   : > { %p677_p13 = pnand %p1187_p3, %p985_p11 }
 0x130   : > { %p678_p5 = pneg %p677_p13 }
 0x132   : > { %873 = dma.done.wait (%p678_p5), %s529_s4, 256  }
 0x133   : > { %875 = vsyncadd (%p678_p5), %s529_s4, 4294967040  ;;  %s22_s17 = sadd.s32 1, %s898_s17   ;;  %s1188_s12 = smov %s882_s13 }
 0x134   : > { %p19_p12 = scmp.ge.s32.totalorder %s22_s17, 4   ;;  %s1189_s13 = smov %s886_s14 }
 0x135   : > { %s1190_s14 = smov %s983_s26  ;;  %s1191_s15 = smov %s894_s16 }
 0x136   : > { %s1192_s16 = smov %s1194_s20  ;;  %21 = sbr.rel (!%p19_p12) target bundleno = 8 (0x8), region = 93 }
 0x13b   :  { %534 = vsyncpa [#allocation3], 1 }
 0x13c   :  { %536 = vsyncpa [#allocation3 + $0x1], 1 }
 0x13d   :  { %537 = vsyncpa [#allocation6], 1 }
 0x13e   :  { %539 = vsyncpa [#allocation6 + $0x1], 1 }
 0x13f   :  { %540 = vsyncpa [#allocation4], 1 }
 0x140   :  { %542 = vsyncpa [#allocation4 + $0x1], 1 }

</bundles_post_ra>
